<compile_context>
chip_gen: v7x
topology: tpu7x:2x2x1
jax: 0.10.0
libtpu: 0.0.40
codegen_flags: <defaults>
</compile_context>

<pallas_src>
import functools

import jax
import jax.numpy as jnp
from jax import lax
from jax.experimental import pallas as pl
from jax.experimental.pallas import tpu as pltpu

_LANE = 128
_SUBLANE = 8
_NEG = -1e30  # bias for padded logit lanes -> exp() underflows to exactly 0


def _round_up(x, m):
    return ((x + m - 1) // m) * m


def _pick_t_blk(T, max_blk=32):
    """Largest divisor of T that is <= max_blk (so the grid tiles T exactly)."""
    best = 1
    for cand in range(1, min(T, max_blk) + 1):
        if T % cand == 0:
            best = cand
    return best


def _rnn_scan_kernel(xp_ref, h0_ref, whh_ref, out_ref, hT_ref, h_scr,
                     *, t_blk, hp):
    """One grid step = t_blk timesteps of the recurrence.

    xp_ref : (t_blk, Bp, hp+op)  precomputed x@W_x + bias, lane-padded (streamed)
    h0_ref : (Bp, hp)            initial hidden, lane-padded (resident)
    whh_ref: (hp, hp+op)         [W_hh | W_ho] lane-padded (resident)
    out_ref: (t_blk, Bp, op)     per-step log-softmax, lane-dense
    hT_ref : (Bp, hp)            final hidden (resident, written on last step)
    h_scr  : (Bp, hp) f32        hidden carried across grid steps
    """
    @pl.when(pl.program_id(0) == 0)
    def _():
        h_scr[...] = h0_ref[...].astype(jnp.float32)

    w = whh_ref[...].astype(jnp.float32)            # resident; loaded once per block

    def step(i, h):
        # fused = [x_t@W_x + b_h | x_t@W_o + b_o] + h @ [W_hh | W_ho]
        fused = xp_ref[i].astype(jnp.float32) + jnp.dot(
            h, w, preferred_element_type=jnp.float32)          # (Bp, hp+op)
        new_h = fused[:, :hp]       # lane-aligned free slice; NO nonlinearity (per module)
        logits = fused[:, hp:]      # lane-aligned; padded lanes ~ -1e30

        # Numerically stable log_softmax over the (padded) output lanes.
        m = jnp.max(logits, axis=-1, keepdims=True)
        s = logits - m
        lse = jnp.log(jnp.sum(jnp.exp(s), axis=-1, keepdims=True))
        out_ref[i] = (s - lse).astype(out_ref.dtype)            # lane-dense store
        return new_h

    h_final = lax.fori_loop(0, t_blk, step, h_scr[...], unroll=True)
    h_scr[...] = h_final                                        # carry to next block

    @pl.when(pl.program_id(0) == pl.num_programs(0) - 1)
    def _():
        hT_ref[...] = h_final.astype(hT_ref.dtype)              # written exactly once


def rnn_scan(xs, h0, w_i2h, b_i2h, w_i2o, b_i2o, *, max_t_blk=32):
    """Run the RNN cell over a whole sequence in a single pallas_call.

    xs: (T, B, I); h0: (B, H). Weights in PyTorch nn.Linear layout
    (out_features, in_features), biases (out_features,).
    Returns (log_probs: (T, B, O), h_final: (B, H)).
    """
    T, B, I = xs.shape
    H = h0.shape[-1]
    O = w_i2o.shape[0]

    HP = _round_up(H, _LANE)          # hidden columns padded to a lane multiple
    OP = _round_up(O, _LANE)          # logit columns padded to a lane multiple
    NF = HP + OP
    Bp = _round_up(max(B, _SUBLANE), _SUBLANE)

    f32 = jnp.float32
    xs = xs.astype(f32)
    h0 = h0.astype(f32)
    w_i2h = w_i2h.astype(f32)
    w_i2o = w_i2o.astype(f32)
    b_i2h = b_i2h.astype(f32)
    b_i2o = b_i2o.astype(f32)

    # Split combined-input weights into x-part and h-part (nn.Linear layout).
    W_ih_x, W_ih_h = w_i2h[:, :I].T, w_i2h[:, I:].T     # (I, H), (H, H)
    W_io_x, W_io_h = w_i2o[:, :I].T, w_i2o[:, I:].T     # (I, O), (H, O)

    # --- Hoisted input projection (one big, perfectly parallel matmul) with the
    # biases folded in, laid out lane-aligned:
    #   cols [0, H)     : x @ W_ih_x + b_i2h   (hidden pre-add)
    #   cols [H, HP)    : 0                    (hidden pad, stays 0)
    #   cols [HP, HP+O) : x @ W_io_x + b_i2o   (logits)
    #   cols [HP+O, NF) : -1e30                (logit pad, killed by the LSE)
    xp_h = jnp.einsum('tbi,ih->tbh', xs, W_ih_x) + b_i2h          # (T, B, H)
    xp_o = jnp.einsum('tbi,io->tbo', xs, W_io_x) + b_i2o          # (T, B, O)
    xp = jnp.concatenate(
        [xp_h, jnp.zeros((T, B, HP - H), f32),
         xp_o, jnp.full((T, B, OP - O), _NEG, f32)], axis=-1)     # (T, B, NF)

    # Recurrent weight, lane-padded: pad rows/columns are zero so padded hidden
    # lanes stay exactly 0 and padded logit lanes stay exactly -1e30.
    whh = jnp.zeros((HP, NF), f32)
    whh = whh.at[:H, :H].set(W_ih_h)
    whh = whh.at[:H, HP:HP + O].set(W_io_h)

    # Pad batch to a sublane multiple and hidden to HP lanes.
    xp_p = jnp.pad(xp, ((0, 0), (0, Bp - B), (0, 0)))
    h0_p = jnp.pad(h0, ((0, Bp - B), (0, HP - H)))

    t_blk = _pick_t_blk(T, max_t_blk)
    kernel = functools.partial(_rnn_scan_kernel, t_blk=t_blk, hp=HP)

    out_p, hT_p = pl.pallas_call(
        kernel,
        out_shape=(
            jax.ShapeDtypeStruct((T, Bp, OP), f32),   # lane-dense log-softmax
            jax.ShapeDtypeStruct((Bp, HP), f32),      # final hidden
        ),
        grid_spec=pltpu.PrefetchScalarGridSpec(
            num_scalar_prefetch=0,
            grid=(T // t_blk,),
            in_specs=[
                pl.BlockSpec((t_blk, Bp, NF), lambda t: (t, 0, 0)),  # xp streamed per block
                pl.BlockSpec((Bp, HP), lambda t: (0, 0)),            # h0 (resident)
                pl.BlockSpec((HP, NF), lambda t: (0, 0)),            # recurrent W (resident)
            ],
            out_specs=[
                pl.BlockSpec((t_blk, Bp, OP), lambda t: (t, 0, 0)),  # per-step log-probs
                pl.BlockSpec((Bp, HP), lambda t: (0, 0)),            # final hidden (resident)
            ],
            scratch_shapes=[pltpu.VMEM((Bp, HP), f32)],              # carried hidden state
        ),
        compiler_params=pltpu.CompilerParams(
            dimension_semantics=("arbitrary",),   # time carries a dependency
        ),
    )(xp_p, h0_p, whh)

    return out_p[:, :B, :O], hT_p[:B, :H]


def rnn_forward(x, h, w_i2h, b_i2h, w_i2o, b_i2o):
    """Exact semantics of the PyTorch module's forward(input, hidden) -- one step."""
    out, new_h = rnn_scan(x[None], h, w_i2h, b_i2h, w_i2o, b_i2o)
    return out[0], new_h


# ------------------------- pure-JAX reference -------------------------------
def _reference_step(x, h, w_i2h, b_i2h, w_i2o, b_i2o):
    combined = jnp.concatenate([x, h], axis=1)
    new_h = combined @ w_i2h.T + b_i2h
    out = jax.nn.log_softmax(combined @ w_i2o.T + b_i2o, axis=1)
    return out, new_h


def _reference_scan(xs, h0, *params):
    outs, h = [], h0
    for t in range(xs.shape[0]):
        o, h = _reference_step(xs[t], h, *params)
        outs.append(o)
    return jnp.stack(outs), h


if __name__ == "__main__":
    input_size, hidden_size, output_size = 32, 32, 16
    batch, seq_len = 2, 8

    key = jax.random.PRNGKey(0)
    k1, k2, k3, k4, k5, k6 = jax.random.split(key, 6)

    # Parameters in nn.Linear layout: W (out, in), b (out,)
    fan_in = input_size + hidden_size
    bound = 1.0 / jnp.sqrt(fan_in)
    w_i2h = jax.random.uniform(k1, (hidden_size, fan_in), jnp.float32, -bound, bound)
    b_i2h = jax.random.uniform(k2, (hidden_size,), jnp.float32, -bound, bound)
    w_i2o = jax.random.uniform(k3, (output_size, fan_in), jnp.float32, -bound, bound)
    b_i2o = jax.random.uniform(k4, (output_size,), jnp.float32, -bound, bound)

    xs = jax.random.normal(k5, (seq_len, batch, input_size), jnp.float32)
    h0 = jax.random.normal(k6, (batch, hidden_size), jnp.float32)
    params = (w_i2h, b_i2h, w_i2o, b_i2o)

    # Single-step forward (exactly the module's forward signature/semantics).
    out1, h1 = rnn_forward(xs[0], h0, *params)
    out1, h1 = jax.block_until_ready((out1, h1))
    ref_out1, ref_h1 = _reference_step(xs[0], h0, *params)
    assert jnp.allclose(out1, ref_out1, atol=1e-4, rtol=1e-4), "step log_softmax mismatch"
    assert jnp.allclose(h1, ref_h1, atol=1e-4, rtol=1e-4), "step hidden mismatch"

    # Fused whole-sequence scan (one pallas_call, time-blocked, hidden in VMEM).
    outs, hT = rnn_scan(xs, h0, *params)
    outs, hT = jax.block_until_ready((outs, hT))
    ref_outs, ref_hT = _reference_scan(xs, h0, *params)
    assert jnp.allclose(outs, ref_outs, atol=1e-4, rtol=1e-4), "scan log_softmax mismatch"
    assert jnp.allclose(hT, ref_hT, atol=1e-4, rtol=1e-4), "scan final hidden mismatch"

    print("KERNEL_OK")
</pallas_src>

<mosaic_0001>
module attributes {stable_mosaic.version = 11 : i64} {
  func.func @_rnn_scan_kernel(%arg0: i32, %arg1: memref<1x8x256xf32, #tpu.memory_space<vmem>>, %arg2: memref<8x128xf32, #tpu.memory_space<vmem>>, %arg3: memref<128x256xf32, #tpu.memory_space<vmem>>, %arg4: memref<1x8x128xf32, #tpu.memory_space<vmem>>, %arg5: memref<8x128xf32, #tpu.memory_space<vmem>>, %arg6: memref<8x128xf32, #tpu.memory_space<vmem>>) attributes {dimension_semantics = [#tpu.dimension_semantics<arbitrary>], iteration_bounds = array<i64: 1>, scalar_prefetch = 0 : i64, scratch_operands = 1 : i64, tpu.core_type = #tpu.core_type<tc>, window_params = [{transform_indices = @transform_0, window_bounds = array<i64: 1, 8, 256>}, {pipeline_mode = #tpu.pipeline_mode<synchronous>, transform_indices = @transform_1, window_bounds = array<i64: 8, 128>}, {pipeline_mode = #tpu.pipeline_mode<synchronous>, transform_indices = @transform_2, window_bounds = array<i64: 128, 256>}, {transform_indices = @transform_3, window_bounds = array<i64: 1, 8, 128>}, {pipeline_mode = #tpu.pipeline_mode<synchronous>, transform_indices = @transform_4, window_bounds = array<i64: 8, 128>}]} {
    %c0_i32 = arith.constant 0 : i32
    %0 = arith.cmpi eq, %arg0, %c0_i32 : i32
    %1 = arith.extui %0 : i1 to i32
    %c0_i32_0 = arith.constant 0 : i32
    %2 = arith.cmpi ne, %1, %c0_i32_0 : i32
    scf.if %2 {
      %c0_15 = arith.constant 0 : index
      %c0_16 = arith.constant 0 : index
      %30 = vector.load %arg2[%c0_15, %c0_16] : memref<8x128xf32, #tpu.memory_space<vmem>>, vector<8x128xf32>
      %c0_17 = arith.constant 0 : index
      %c0_18 = arith.constant 0 : index
      %31 = vector.load %arg6[%c0_17, %c0_18] : memref<8x128xf32, #tpu.memory_space<vmem>>, vector<8x128xf32>
      tpu.vector_store %arg6[%c0_17, %c0_18], %30 {strides = array<i32>} : memref<8x128xf32, #tpu.memory_space<vmem>>, vector<8x128xf32>,
    } else {
    }
    %c0 = arith.constant 0 : index
    %c0_1 = arith.constant 0 : index
    %3 = vector.load %arg3[%c0, %c0_1] : memref<128x256xf32, #tpu.memory_space<vmem>>, vector<128x256xf32>
    %c0_2 = arith.constant 0 : index
    %c0_3 = arith.constant 0 : index
    %4 = vector.load %arg6[%c0_2, %c0_3] : memref<8x128xf32, #tpu.memory_space<vmem>>, vector<8x128xf32>
    %c0_i32_4 = arith.constant 0 : i32
    %5 = arith.index_cast %c0_i32_4 : i32 to index
    %c0_5 = arith.constant 0 : index
    %c0_6 = arith.constant 0 : index
    %6 = vector.load %arg1[%5, %c0_5, %c0_6] : memref<1x8x256xf32, #tpu.memory_space<vmem>>, vector<1x8x256xf32>
    %7 = vector.shape_cast %6 : vector<1x8x256xf32> to vector<8x256xf32>
    %cst = arith.constant dense<0.000000e+00> : vector<8x256xf32>
    %8 = tpu.matmul %4, %3, %cst {dimension_numbers = #tpu.dot_dimension_numbers<[1], [0], [0], [1], [0, 0, 1, 1], [], []>} : vector<8x128xf32>, vector<128x256xf32>, vector<8x256xf32> -> vector<8x256xf32>
    %9 = arith.addf %7, %8 : vector<8x256xf32>
    %10 = vector.extract_strided_slice %9 {offsets = [0, 0], sizes = [8, 128], strides = [1, 1]} : vector<8x256xf32> to vector<8x128xf32>
    %11 = vector.extract_strided_slice %9 {offsets = [0, 128], sizes = [8, 128], strides = [1, 1]} : vector<8x256xf32> to vector<8x128xf32>
    %cst_7 = arith.constant dense<0xFF800000> : vector<8xf32>
    %12 = vector.multi_reduction <maximumf>, %11, %cst_7 [1] : vector<8x128xf32> to vector<8xf32>
    %13 = vector.shape_cast %12 : vector<8xf32> to vector<8x1xf32>
    %14 = vector.broadcast %13 : vector<8x1xf32> to vector<8x128xf32>
    %15 = arith.subf %11, %14 : vector<8x128xf32>
    %16 = math.exp %15 : vector<8x128xf32>
    %cst_8 = arith.constant dense<0.000000e+00> : vector<8xf32>
    %17 = vector.multi_reduction <add>, %16, %cst_8 [1] : vector<8x128xf32> to vector<8xf32>
    %18 = vector.shape_cast %17 : vector<8xf32> to vector<8x1xf32>
    %19 = math.log %18 : vector<8x1xf32>
    %20 = vector.broadcast %19 : vector<8x1xf32> to vector<8x128xf32>
    %21 = arith.subf %15, %20 : vector<8x128xf32>
    %22 = arith.index_cast %c0_i32_4 : i32 to index
    %c0_9 = arith.constant 0 : index
    %c0_10 = arith.constant 0 : index
    %23 = vector.load %arg4[%22, %c0_9, %c0_10] : memref<1x8x128xf32, #tpu.memory_space<vmem>>, vector<1x8x128xf32>
    %24 = vector.shape_cast %23 : vector<1x8x128xf32> to vector<8x128xf32>
    %25 = vector.shape_cast %21 : vector<8x128xf32> to vector<1x8x128xf32>
    tpu.vector_store %arg4[%22, %c0_9, %c0_10], %25 {strides = array<i32>} : memref<1x8x128xf32, #tpu.memory_space<vmem>>, vector<1x8x128xf32>,
    %c1_i32 = arith.constant 1 : i32
    %c0_11 = arith.constant 0 : index
    %c0_12 = arith.constant 0 : index
    %26 = vector.load %arg6[%c0_11, %c0_12] : memref<8x128xf32, #tpu.memory_space<vmem>>, vector<8x128xf32>
    tpu.vector_store %arg6[%c0_11, %c0_12], %10 {strides = array<i32>} : memref<8x128xf32, #tpu.memory_space<vmem>>, vector<8x128xf32>,
    %c0_i32_13 = arith.constant 0 : i32
    %27 = arith.cmpi eq, %arg0, %c0_i32_13 : i32
    %28 = arith.extui %27 : i1 to i32
    %c0_i32_14 = arith.constant 0 : i32
    %29 = arith.cmpi ne, %28, %c0_i32_14 : i32
    scf.if %29 {
      %c0_15 = arith.constant 0 : index
      %c0_16 = arith.constant 0 : index
      %30 = vector.load %arg5[%c0_15, %c0_16] : memref<8x128xf32, #tpu.memory_space<vmem>>, vector<8x128xf32>
      tpu.vector_store %arg5[%c0_15, %c0_16], %10 {strides = array<i32>} : memref<8x128xf32, #tpu.memory_space<vmem>>, vector<8x128xf32>,
    } else {
    }
    return
  }
  func.func @transform_0(%arg0: i32) -> (i32, i32, i32) {
    %c0_i32 = arith.constant 0 : i32
    %c0_i32_0 = arith.constant 0 : i32
    %c0_i32_1 = arith.constant 0 : i32
    return %arg0, %c0_i32, %c0_i32_0 : i32, i32, i32
  }
  func.func @transform_1(%arg0: i32) -> (i32, i32) {
    %c0_i32 = arith.constant 0 : i32
    %c0_i32_0 = arith.constant 0 : i32
    %c0_i32_1 = arith.constant 0 : i32
    return %c0_i32, %c0_i32_0 : i32, i32
  }
  func.func @transform_2(%arg0: i32) -> (i32, i32) {
    %c0_i32 = arith.constant 0 : i32
    %c0_i32_0 = arith.constant 0 : i32
    %c0_i32_1 = arith.constant 0 : i32
    return %c0_i32, %c0_i32_0 : i32, i32
  }
  func.func @transform_3(%arg0: i32) -> (i32, i32, i32) {
    %c0_i32 = arith.constant 0 : i32
    %c0_i32_0 = arith.constant 0 : i32
    %c0_i32_1 = arith.constant 0 : i32
    return %arg0, %c0_i32, %c0_i32_0 : i32, i32, i32
  }
  func.func @transform_4(%arg0: i32) -> (i32, i32) {
    %c0_i32 = arith.constant 0 : i32
    %c0_i32_0 = arith.constant 0 : i32
    %c0_i32_1 = arith.constant 0 : i32
    return %c0_i32, %c0_i32_0 : i32, i32
  }
}

</mosaic_0001>

<bundles_post_ra>
// kernel: tpu_custom_call.1
= control target key start
LH: loop header
LB: loop body
LE: loop exit
PB: predicated region body
PF: predicated region fallthrough
CT: control target
= control target key end

     0   :  { %10 = vsyncpa [#allocation4], 0  ;;  %s470_s0 = inlined_call_operand.hbm [shape: f32[1,8,256], index: 0, kind: input, shape index: {}]   ;;  %s471_s1 = inlined_call_operand.hbm [shape: f32[8,128], index: 1, kind: input, shape index: {}]   ;;  %s472_s2 = inlined_call_operand.hbm [shape: f32[128,256], index: 2, kind: input, shape index: {}]   ;;  %s473_s3 = inlined_call_operand.hbm [shape: f32[1,8,128], index: 3, kind: output, shape index: {0}]   ;;  %s474_s4 = inlined_call_operand.hbm [shape: f32[8,128], index: 4, kind: output, shape index: {1}]  }
   0x1   :  { %11 = vsyncpa [#allocation7], 0 }
   0x2   :  { %12 = vsyncpa [#allocation5], 0 }
   0x3   :  { %13 = vsyncpa [#allocation11], 0  ;;  %s377_s15 = smov [#allocation6]   ;;  %s378_s17 = smov [#allocation3]  }
   0x4   :  { %s30_s16 = sshll.u32 %s377_s15, 4  ;;  %s20_s18 = sshll.u32 %s378_s17, 4  ;;  %s31_s16 = int_to_ptr.vmem [resolvable:$true] %s30_s16  ;;  %s21_s18 = int_to_ptr.vmem [resolvable:$true] %s20_s18 }
   0x5   :  { %s259_s21 = scalar_lea.hbm %s471_s1, 128 }
   0x6   :  { %p260_p0 = scmp.ne.s32.totalorder %s471_s1, %s259_s21  ;;  %p263_p1 = scmp.lt.u32.totalorder %s259_s21, %s471_s1 }
   0x8   :  { %p265_p2 = pnand %p263_p1, %p260_p0 }
   0xa   :  { %268 = shalt.err (!%p265_p2)
}
   0xb   :  { %s269_s26 = scalar_lea.vmem %s31_s16, 128  ;;  %p274_p4 = scmp.lt.s32.totalorder %s31_s16, %s31_s16 }
   0xc   :  { %p270_p3 = scmp.ne.s32.totalorder %s31_s16, %s269_s26  ;;  %p275_p5 = scmp.lt.s32.totalorder %s269_s26, %s269_s26 }
   0xe   :  { %p276_p6 = por %p275_p5, %p274_p4 }
  0x10   :  { %p277_p7 = pnand %p276_p6, %p270_p3 }
  0x12   :  { %280 = shalt.err (!%p277_p7)
}
  0x13   :  { %33 = dma.hbm_to_vmem [thread:$0]  %s471_s1, 128, %s31_s16, [#allocation7]  }
  0x14   :  { %s281_s5 = scalar_lea.hbm %s470_s0, 256 }
  0x15   :  { %p282_p8 = scmp.ne.s32.totalorder %s470_s0, %s281_s5  ;;  %p285_p9 = scmp.lt.u32.totalorder %s281_s5, %s470_s0 }
  0x17   :  { %p287_p10 = pnand %p285_p9, %p282_p8 }
  0x19   :  { %290 = shalt.err (!%p287_p10)
}
  0x1a   :  { %s291_s10 = scalar_lea.vmem %s21_s18, 256  ;;  %p296_p12 = scmp.lt.s32.totalorder %s21_s18, %s21_s18 }
  0x1b   :  { %p292_p11 = scmp.ne.s32.totalorder %s21_s18, %s291_s10  ;;  %p297_p13 = scmp.lt.s32.totalorder %s291_s10, %s291_s10 }
  0x1d   :  { %p298_p0 = por %p297_p13, %p296_p12 }
  0x1f   :  { %p299_p1 = pnand %p298_p0, %p292_p11 }
  0x21   :  { %302 = shalt.err (!%p299_p1)
}
  0x22   :  { %23 = dma.hbm_to_vmem [thread:$0]  %s470_s0, 256, %s21_s18, [#allocation4]  }
  0x23   :  { %s379_s12 = smov [#allocation8]   ;;  %s303_s16 = scalar_lea.hbm %s472_s2, 4096 }
  0x24   :  { %s39_s13 = sshll.u32 %s379_s12, 4  ;;  %p304_p2 = scmp.ne.s32.totalorder %s472_s2, %s303_s16  ;;  %s40_s13 = int_to_ptr.vmem [resolvable:$true] %s39_s13 }
  0x25   :  { %p307_p3 = scmp.lt.u32.totalorder %s303_s16, %s472_s2 }
  0x27   :  { %p309_p4 = pnand %p307_p3, %p304_p2 }
  0x29   :  { %312 = shalt.err (!%p309_p4)
}
  0x2a   :  { %s313_s22 = scalar_lea.vmem %s40_s13, 4096  ;;  %p318_p6 = scmp.lt.s32.totalorder %s40_s13, %s40_s13 }
  0x2b   :  { %p314_p5 = scmp.ne.s32.totalorder %s40_s13, %s313_s22  ;;  %p319_p7 = scmp.lt.s32.totalorder %s313_s22, %s313_s22 }
  0x2d   :  { %p320_p8 = por %p319_p7, %p318_p6 }
  0x2f   :  { %p321_p9 = pnand %p320_p8, %p314_p5 }
  0x31   :  { %324 = shalt.err (!%p321_p9)
}
  0x32   :  { %s380_s0 = smov 256   ;;  %s381_s18 = smov 16  }
  0x33   :  { %45 = dma.hbm_to_vmem [thread:$0]  %s472_s2, 4096, %s40_s13, [#allocation7], %s380_s0, %s380_s0, %s381_s18  }
  0x34   :  { %369 = dma.done.wait [#allocation4], 256  }
  0x35   :  { %370 = vsyncadd [#allocation4], 4294967040 }
  0x36   :  { %371 = dma.done.wait [#allocation7], 4224  }
  0x37   :  { %372 = vsyncadd [#allocation7], 4294963072  ;;  %v382_v0 = vmov 0.0   ;;  %v62_v1 = vld [vmem:[#allocation8 + $0x8] sm:$0xff]  ;;  %v64_v2 = vld [vmem:[#allocation8 + $0x18] sm:$0xff]  ;;  %s383_s2 = smov [#allocation10]  }
  0x38   :  { %160 = vmatprep.mubr.f32.mxu0 %v382_v0  ;;  %v61_v3 = vld [vmem:[#allocation8] sm:$0xff]  ;;  %v215_v4 = vpack.c.bf16 %v64_v2, %v62_v1  ;;  %v63_v5 = vld [vmem:[#allocation8 + $0x10] sm:$0xff]  ;;  %v66_v6 = vld [vmem:[#allocation8 + $0x28] sm:$0xff]  ;;  %s201_s25 = sshll.u32 %s383_s2, 4  ;;  %s202_s25 = int_to_ptr.vmem [resolvable:$true] %s201_s25 }
  0x39   :  { %v68_v7 = vld [vmem:[#allocation8 + $0x38] sm:$0xff]  ;;  %v217_v8 = vpack.c.bf16 %v63_v5, %v61_v3  ;;  %v65_v10 = vld [vmem:[#allocation8 + $0x20] sm:$0xff]  ;;  %v67_v11 = vld [vmem:[#allocation8 + $0x30] sm:$0xff]  ;;  %s325_s26 = scalar_lea.vmem %s202_s25, 128  ;;  %p330_p11 = scmp.lt.s32.totalorder %s202_s25, %s202_s25 }
  0x3a   :  { %v219_v9 = vpack.c.bf16 %v68_v7, %v66_v6  ;;  %v70_v12 = vld [vmem:[#allocation8 + $0x48] sm:$0xff]  ;;  %216 = vmatprep.subr.bf16.mxu0 %v215_v4  ;;  %v72_v13 = vld [vmem:[#allocation8 + $0x58] sm:$0xff]  ;;  %v221_v14 = vpack.c.bf16 %v67_v11, %v65_v10  ;;  %v69_v16 = vld [vmem:[#allocation8 + $0x40] sm:$0xff]  ;;  %p326_p10 = scmp.ne.s32.totalorder %s202_s25, %s325_s26  ;;  %p331_p12 = scmp.lt.s32.totalorder %s325_s26, %s325_s26 }
  0x3b   :  { %218 = vmatpush1.bf16.msra.mxu0 %v217_v8  ;;  %v223_v15 = vpack.c.bf16 %v72_v13, %v70_v12  ;;  %v71_v17 = vld [vmem:[#allocation8 + $0x50] sm:$0xff]  ;;  %v74_v18 = vld [vmem:[#allocation8 + $0x68] sm:$0xff]  ;;  %v76_v19 = vld [vmem:[#allocation8 + $0x78] sm:$0xff] }
  0x3c   :  { %220 = vmatprep.subr.bf16.mxu0 %v219_v9  ;;  %v225_v20 = vpack.c.bf16 %v71_v17, %v69_v16  ;;  %v227_v21 = vpack.c.bf16 %v76_v19, %v74_v18  ;;  %v73_v22 = vld [vmem:[#allocation8 + $0x60] sm:$0xff]  ;;  %v75_v23 = vld [vmem:[#allocation8 + $0x70] sm:$0xff]  ;;  %v78_v24 = vld [vmem:[#allocation8 + $0x88] sm:$0xff]  ;;  %p332_p13 = por %p331_p12, %p330_p11 }
  0x3d   :  { %v80_v25 = vld [vmem:[#allocation8 + $0x98] sm:$0xff]  ;;  %v229_v26 = vpack.c.bf16 %v75_v23, %v73_v22  ;;  %v77_v28 = vld [vmem:[#allocation8 + $0x80] sm:$0xff]  ;;  %v79_v29 = vld [vmem:[#allocation8 + $0x90] sm:$0xff] }
  0x3e   :  { %v231_v27 = vpack.c.bf16 %v80_v25, %v78_v24  ;;  %v82_v30 = vld [vmem:[#allocation8 + $0xa8] sm:$0xff]  ;;  %v84_v31 = vld [vmem:[#allocation8 + $0xb8] sm:$0xff]  ;;  %v233_v32 = vpack.c.bf16 %v79_v29, %v77_v28  ;;  %v81_v34 = vld [vmem:[#allocation8 + $0xa0] sm:$0xff]  ;;  %p333_p0 = pnand %p332_p13, %p326_p10 }
  0x3f   :  { %222 = vmatpush1.bf16.msra.mxu0 %v221_v14  ;;  %v235_v33 = vpack.c.bf16 %v84_v31, %v82_v30  ;;  %v83_v35 = vld [vmem:[#allocation8 + $0xb0] sm:$0xff]  ;;  %v86_v36 = vld [vmem:[#allocation8 + $0xc8] sm:$0xff]  ;;  %v88_v37 = vld [vmem:[#allocation8 + $0xd8] sm:$0xff] }
  0x40   :  { %224 = vmatprep.subr.bf16.mxu0 %v223_v15  ;;  %v237_v38 = vpack.c.bf16 %v83_v35, %v81_v34  ;;  %v239_v39 = vpack.c.bf16 %v88_v37, %v86_v36  ;;  %v85_v40 = vld [vmem:[#allocation8 + $0xc0] sm:$0xff]  ;;  %v87_v41 = vld [vmem:[#allocation8 + $0xd0] sm:$0xff]  ;;  %v90_v42 = vld [vmem:[#allocation8 + $0xe8] sm:$0xff] }
  0x41   :  { %v92_v43 = vld [vmem:[#allocation8 + $0xf8] sm:$0xff]  ;;  %v241_v44 = vpack.c.bf16 %v87_v41, %v85_v40  ;;  %v89_v46 = vld [vmem:[#allocation8 + $0xe0] sm:$0xff]  ;;  %v91_v47 = vld [vmem:[#allocation8 + $0xf0] sm:$0xff] }
  0x42   :  { %v243_v45 = vpack.c.bf16 %v92_v43, %v90_v42  ;;  %v245_v48 = vpack.c.bf16 %v91_v47, %v89_v46  ;;  %v59_v49 = vld [vmem:[#allocation6] sm:$0xff]  ;;  %v94_v50 = vld [vmem:[#allocation3] sm:$0xff]  ;;  %v95_v51 = vld [vmem:[#allocation3 + $0x8] sm:$0xff] }
  0x43   :  { %226 = vmatpush1.bf16.msra.mxu0 %v225_v20 }
  0x44   :  { %228 = vmatprep.subr.bf16.mxu0 %v227_v21 }
  0x47   :  { %230 = vmatpush1.bf16.msra.mxu0 %v229_v26 }
  0x48   :  { %232 = vmatprep.subr.bf16.mxu0 %v231_v27 }
  0x4b   :  { %234 = vmatpush1.bf16.msra.mxu0 %v233_v32 }
  0x4c   :  { %236 = vmatprep.subr.bf16.mxu0 %v235_v33 }
  0x4f   :  { %238 = vmatpush1.bf16.msra.mxu0 %v237_v38 }
  0x50   :  { %240 = vmatprep.subr.bf16.mxu0 %v239_v39 }
  0x53   :  { %242 = vmatpush1.bf16.msra.mxu0 %v241_v44 }
  0x54   :  { %244 = vmatprep.subr.bf16.mxu0 %v243_v45 }
  0x57   :  { %246 = vmatpush1.bf16.msra.mxu0 %v245_v48 }
  0x5a   :  { %161 = vmatmul.mubr.f32.vlgmr.msra.gmra.mrb[0].mxu0 %v59_v49 }
 0x12d   :  { %v162_v52 = vpop.f32.mrb[0].mxu0 }
 0x12e   :  { %v167_v53 = vadd.f32 %v162_v52, %v94_v50  ;;  %v164_v54 = vpop.f32.mrb[1].mxu0 }
 0x12f   :  { %v168_v55 = vadd.f32 %v164_v54, %v95_v51 }
 0x130   :  { %184 = vst [vmem:[#allocation10] sm:$0xff] %v167_v53 }
 0x131   :  { %169 = vmax.xlane.f32.xlu0 %v168_v55 }
 0x1be   :  { %v170_v56 = vpop.xlane.xlu0 %169 }
 0x1bf   :  { %v171_v57 = vsub.f32 %v168_v55, %v170_v56 }
 0x1c1   :  { %v172_v58 = vmul.f32 1.442695, %v171_v57 }
 0x1c3   :  { %255 = vpow2.f32 %v172_v58 }
 0x1cd   :  { %v256_v59 = vpop.eup %255 }
 0x1ce   :  { %174 = vadd.xlane.f32.xlu0 %v256_v59 }
 0x1cf   :  { %336 = shalt.err (!%p333_p0)
}
 0x1d0   :  { %s337_s29 = scalar_lea.hbm %s474_s4, 128 }
 0x1d1   :  { %p338_p1 = scmp.ne.s32.totalorder %s474_s4, %s337_s29  ;;  %p341_p2 = scmp.lt.u32.totalorder %s337_s29, %s474_s4 }
 0x1d3   :  { %p343_p3 = pnand %p341_p2, %p338_p1 }
 0x1d5   :  { %346 = shalt.err (!%p343_p3)
}
 0x1d6   :  { %204 = dma.vmem_to_hbm [thread:$0]  %s202_s25, 128, %s474_s4, [#allocation11]  }
 0x1d7   :  { %s384_s10 = smov [#allocation9]  }
 0x1d8   :  { %s191_s1 = sshll.u32 %s384_s10, 4  ;;  %s192_s1 = int_to_ptr.vmem [resolvable:$true] %s191_s1 }
 0x1d9   :  { %s347_s11 = scalar_lea.vmem %s192_s1, 128  ;;  %p352_p5 = scmp.lt.s32.totalorder %s192_s1, %s192_s1 }
 0x1da   :  { %p348_p4 = scmp.ne.s32.totalorder %s192_s1, %s347_s11  ;;  %p353_p6 = scmp.lt.s32.totalorder %s347_s11, %s347_s11 }
 0x1dc   :  { %p354_p7 = por %p353_p6, %p352_p5 }
 0x1de   :  { %p355_p8 = pnand %p354_p7, %p348_p4 }
 0x25b   :  { %v175_v60 = vpop.xlane.xlu0 %174 }
 0x25c   :  { %257 = vlog2.f32 %v175_v60 }
 0x266   :  { %v258_v61 = vpop.eup %257 }
 0x267   :  { %v177_v62 = vmul.f32 0.6931472, %v258_v61 }
 0x269   :  { %v178_v63 = vsub.f32 %v171_v57, %v177_v62 }
 0x26b   :  { %179 = vst [vmem:[#allocation9] sm:$0xff] %v178_v63 }
 0x26c   :  { %358 = shalt.err (!%p355_p8)
}
 0x26d   :  { %s359_s4 = scalar_lea.hbm %s473_s3, 128 }
 0x26e   :  { %p360_p9 = scmp.ne.s32.totalorder %s473_s3, %s359_s4  ;;  %p363_p10 = scmp.lt.u32.totalorder %s359_s4, %s473_s3 }
 0x270   :  { %p365_p11 = pnand %p363_p10, %p360_p9 }
 0x272   :  { %368 = shalt.err (!%p365_p11)
}
 0x273   :  { %194 = dma.vmem_to_hbm [thread:$0]  %s192_s1, 128, %s473_s3, [#allocation5]  }
 0x274   :  { %373 = dma.done.wait [#allocation5], 128  }
 0x275   :  { %374 = vsyncadd [#allocation5], 4294967168 }
 0x276   :  { %375 = dma.done.wait [#allocation11], 128  }
 0x277   :  { %376 = vsyncadd [#allocation11], 4294967168 }
 0x278   :  { %211 = vsyncpa [#allocation4], 1 }
 0x279   :  { %212 = vsyncpa [#allocation7], 1 }
 0x27a   :  { %213 = vsyncpa [#allocation5], 1 }
 0x27b   :  { %214 = vsyncpa [#allocation11], 1 }

</bundles_post_ra>
